<compile_context>
chip_gen: v7x
topology: tpu7x:2x2x1
jax: 0.10.0
libtpu: 0.0.40
codegen_flags: <defaults>
</compile_context>

<pallas_src>
import functools
import math

import jax
import jax.numpy as jnp
import numpy as np
from jax.experimental import pallas as pl
from jax.experimental.pallas import tpu as pltpu

# --- static hyperparameters (match the PyTorch module defaults) -------------
TEMPERATURE = 1.0          # self.temperature
SCALED_TEMP = 0.2          # hard-coded in forward for confidence
UNC_THRESH = 0.5           # self.uncertainty_threshold
CONF_BOOST = 4.0           # self.confidence_boost (implemented as c^4 below)
TEMP_SCALING = 0.95        # nn.Parameter(ones(1)*0.95) clamped to [0.8, 1.2]

# The e**5 trick below requires TEMPERATURE/SCALED_TEMP == 5 exactly.
assert abs(TEMPERATURE / SCALED_TEMP - 5.0) < 1e-12


# ------------------------------- fused kernel -------------------------------
def _fused_kernel(x_ref, w_ref, b_ref, bw_ref, out_ref, acc_ref, *, M, K):
    # x_ref  : [TF, TB]   bf16  (features transposed: batch in lanes)
    # w_ref  : [M*K, TF]  bf16  (all models folded into the MXU M dim)
    # b_ref  : [M*K, 1]   f32
    # bw_ref : [M]        f32   (SMEM scalars)
    # out_ref: [K, TB]    f32   (transposed output; wrapper transposes back)
    # acc_ref: [M*K, TB]  f32   (VMEM accumulator, persistent across F tiles)
    kf = pl.program_id(1)
    nk = pl.num_programs(1)

    @pl.when(kf == 0)
    def _init():
        # Fold the bias into the accumulator init (saves an epilogue add).
        acc_ref[...] = jnp.broadcast_to(b_ref[...], acc_ref.shape)

    acc_ref[...] += jnp.dot(w_ref[...], x_ref[...],
                            preferred_element_type=jnp.float32)

    @pl.when(kf == nk - 1)
    def _epilogue():
        acc = acc_ref[...]                                   # [M*K, TB] logits
        inv_T = jnp.float32(1.0 / TEMPERATURE)
        inv_logK = jnp.float32(1.0 / math.log(K))

        probs_l, conf_l, ent_l = [], [], []
        for m in range(M):
            # Sublane-aligned (K=8 rows) zero-cost view of model m's logits.
            lg = acc[m * K:(m + 1) * K, :]                   # [K, TB]
            lmax = jnp.max(lg, axis=0, keepdims=True)        # [1, TB]
            sh = (lg - lmax) * inv_T
            e = jnp.exp(sh)                                  # EUP
            z = jnp.sum(e, axis=0, keepdims=True)            # [1, TB]
            p = e * pl.reciprocal(z, approx=True)            # [K, TB]
            # confidence = max softmax(logits/0.2) = 1 / sum(exp(5*sh)) = 1/sum(e^5)
            e2 = e * e
            z5 = jnp.sum(e2 * e2 * e, axis=0, keepdims=True)  # [1, TB] (VPU)
            conf = 1.0 / z5                                   # exact, tiny
            # entropy from logits: H = log Z - sum(p * sh)
            ent = jnp.log(z) - jnp.sum(p * sh, axis=0, keepdims=True)
            probs_l.append(p)
            conf_l.append(conf)
            ent_l.append(ent)

        mean_p = probs_l[0]
        for m in range(1, M):
            mean_p = mean_p + probs_l[m]
        mean_p = mean_p * jnp.float32(1.0 / M)               # [K, TB]

        w_l = []
        for m in range(M):
            p, conf, ent = probs_l[m], conf_l[m], ent_l[m]
            unc = ent * inv_logK
            uw = jnp.exp(-2.0 * unc)
            c2 = conf * conf
            cw = c2 * c2                                      # confidence ** 4
            div = jnp.abs(p - mean_p)                         # [K, TB]
            agree = 1.0 - jnp.sum(div, axis=0, keepdims=True) * jnp.float32(1.0 / K)
            aw = agree * agree * agree
            dv = jnp.max(div, axis=0, keepdims=True) * conf
            dw = dv * dv
            ew = jnp.exp(-ent) * conf
            combo = (0.15 * uw + 0.4 * cw + 0.25 * aw + 0.1 * dw + 0.1 * ew)
            uf = jnp.exp(-jnp.maximum(unc - UNC_THRESH, 0.0) * 0.5)
            combo = combo * (0.9 + 0.1 * uf)
            w_l.append(bw_ref[m] * combo)                     # scalar * [1, TB]

        w_sum = w_l[0]
        for m in range(1, M):
            w_sum = w_sum + w_l[m]
        inv_wsum = 1.0 / (w_sum + 1e-10)                      # exact, tiny

        wp = w_l[0] * probs_l[0]
        for m in range(1, M):
            wp = wp + w_l[m] * probs_l[m]                     # [K, TB]
        wp = wp * inv_wsum                                    # normalized mix

        # TODO(synk): class_weights re-balancing path omitted (module default
        # class_weights=None).
        wp = wp * jnp.float32(1.0 / TEMP_SCALING)
        wmax = jnp.max(wp, axis=0, keepdims=True)
        we = jnp.exp(wp - wmax)
        out_ref[...] = we / jnp.sum(we, axis=0, keepdims=True)  # exact norm


# ------------------------------- wrapper -------------------------------------
def _largest_divisor_leq(n, cap):
    d = max(1, min(int(cap), int(n)))
    while n % d:
        d -= 1
    return d


def uncertainty_guided_ensemble(x_nchw, W, b, base_weights, *,
                                tile_b=512, tile_f=1024,
                                vmem_limit_bytes=48 * 1024 * 1024):
    Bt = x_nchw.shape[0]
    F = int(np.prod(x_nchw.shape[1:]))
    M, F2, K = W.shape
    assert F2 == F

    # Lane-dense layout: batch is the lane (last) dim everywhere in the kernel.
    # TODO(synk): in a real pipeline the backbone should emit bf16 [F, B]
    # features directly so this transpose+cast fuses into the producer instead
    # of a standalone HBM round trip.
    xt = jnp.transpose(x_nchw.reshape(Bt, F).astype(jnp.bfloat16))      # [F, B]
    wt = jnp.transpose(W, (0, 2, 1)).reshape(M * K, F).astype(jnp.bfloat16)
    b_col = b.reshape(M * K, 1).astype(jnp.float32)
    bw = base_weights.astype(jnp.float32).reshape(M)

    tb = _largest_divisor_leq(Bt, tile_b)
    if tb != Bt and tb % 128 != 0:
        tb = Bt                    # lane dim must be %128 or the full extent
    tf = _largest_divisor_leq(F, tile_f)
    if tf != F and tf % 128 != 0:
        tf = F
    grid = (Bt // tb, F // tf)     # (batch tiles [parallel], reduction tiles)

    kernel = functools.partial(_fused_kernel, M=M, K=K)
    out_t = pl.pallas_call(
        kernel,
        out_shape=jax.ShapeDtypeStruct((K, Bt), jnp.float32),
        grid=grid,
        in_specs=[
            pl.BlockSpec((tf, tb), lambda bi, kf: (kf, bi)),     # x^T
            pl.BlockSpec((M * K, tf), lambda bi, kf: (0, kf)),   # folded W^T
            pl.BlockSpec((M * K, 1), lambda bi, kf: (0, 0)),     # bias
            pl.BlockSpec(memory_space=pltpu.MemorySpace.SMEM),   # base weights
        ],
        out_specs=pl.BlockSpec((K, tb), lambda bi, kf: (0, bi)),
        scratch_shapes=[pltpu.VMEM((M * K, tb), jnp.float32)],
        compiler_params=pltpu.CompilerParams(
            dimension_semantics=("parallel", "arbitrary"),
            vmem_limit_bytes=vmem_limit_bytes,
        ),
    )(xt, wt, b_col, bw)
    return jnp.transpose(out_t)    # [B, K]


# ----------------------------- pure-JAX reference ----------------------------
def _reference(x_nchw, W, b, base_weights):
    Bt = x_nchw.shape[0]
    x = x_nchw.reshape(Bt, -1).astype(jnp.float32)
    M, _, K = W.shape
    logits = jnp.einsum('bf,mfk->mbk', x, W,
                        precision=jax.lax.Precision.HIGHEST) + b[:, None, :]
    probs = jax.nn.softmax(logits / TEMPERATURE, axis=-1)
    scaled = jax.nn.softmax(logits / SCALED_TEMP, axis=-1)
    confidence = jnp.max(scaled, axis=-1)
    entropy = -jnp.sum(probs * jnp.log(probs + 1e-10), axis=-1)
    uncertainty = entropy / jnp.log(jnp.float32(K))
    uw = jnp.exp(-uncertainty * 2.0)
    cw = jnp.power(confidence, CONF_BOOST)
    mean_probs = jnp.mean(probs, axis=0, keepdims=True)
    diversity = jnp.abs(probs - mean_probs)
    agreement = 1.0 - jnp.mean(diversity, axis=2)
    aw = jnp.power(agreement, 3.0)
    dw = jnp.power(jnp.max(diversity, axis=2) * confidence, 2.0)
    ew = jnp.exp(-entropy) * confidence
    w = base_weights.reshape(M, 1) * (0.15 * uw + 0.4 * cw + 0.25 * aw
                                      + 0.1 * dw + 0.1 * ew)
    uf = jnp.exp(-jnp.clip(uncertainty - UNC_THRESH, 0.0, None) * 0.5)
    w = w * (0.9 + 0.1 * uf)
    w = w / (jnp.sum(w, axis=0, keepdims=True) + 1e-10)
    wp = jnp.sum(w[:, :, None] * probs, axis=0)
    return jax.nn.softmax(wp / TEMP_SCALING, axis=-1)


# ---------------------------------- main --------------------------------------
if __name__ == "__main__":
    # Small shapes consistent with the module's image-classification forward.
    B, C, H, Wd = 2, 4, 16, 16          # inputs: NCHW
    M = 3                               # number of ensemble models
    K = 8                               # number of classes
    F = C * H * Wd

    key = jax.random.PRNGKey(0)
    kx, kw, kb = jax.random.split(key, 3)
    x = jax.random.normal(kx, (B, C, H, Wd), dtype=jnp.float32)
    W = 0.02 * jax.random.normal(kw, (M, F, K), dtype=jnp.float32)
    bvec = 0.1 * jax.random.normal(kb, (M, K), dtype=jnp.float32)
    base_weights = jnp.ones((M,), dtype=jnp.float32) / M   # model_weights=None

    out = uncertainty_guided_ensemble(x, W, bvec, base_weights)
    out = jax.block_until_ready(out)

    ref = _reference(x, W, bvec, base_weights)
    # bf16 MXU operands + approx EUP reciprocal on probs introduce ~1e-3-level
    # differences after the /0.2 softmax and ^4 amplification.
    np.testing.assert_allclose(np.asarray(out), np.asarray(ref),
                               rtol=2e-2, atol=1e-2)
    assert out.shape == (B, K)
    # rows of the output are probability distributions (exact final divide)
    np.testing.assert_allclose(np.asarray(out).sum(axis=1),
                               np.ones(B), rtol=1e-5, atol=1e-5)

    print("KERNEL_OK")
</pallas_src>

<mosaic_0001>
module attributes {stable_mosaic.version = 11 : i64} {
  func.func @_fused_kernel(%arg0: i32, %arg1: i32, %arg2: memref<1024x2xbf16, #tpu.memory_space<vmem>>, %arg3: memref<24x1024xbf16, #tpu.memory_space<vmem>>, %arg4: memref<24x1xf32, #tpu.memory_space<vmem>>, %arg5: memref<3xf32, #tpu.memory_space<smem>>, %arg6: memref<8x2xf32, #tpu.memory_space<vmem>>, %arg7: memref<24x2xf32, #tpu.memory_space<vmem>>) attributes {dimension_semantics = [#tpu.dimension_semantics<parallel>, #tpu.dimension_semantics<arbitrary>], iteration_bounds = array<i64: 1, 1>, scalar_prefetch = 0 : i64, scratch_operands = 1 : i64, tpu.core_type = #tpu.core_type<tc>, window_params = [{transform_indices = @transform_0, window_bounds = array<i64: 1024, 2>}, {transform_indices = @transform_1, window_bounds = array<i64: 24, 1024>}, {pipeline_mode = #tpu.pipeline_mode<synchronous>, transform_indices = @transform_2, window_bounds = array<i64: 24, 1>}, {transform_indices = @transform_3, window_bounds = array<i64: 3>}, {transform_indices = @transform_4, window_bounds = array<i64: 8, 2>}]} {
    %c0_i32 = arith.constant 0 : i32
    %0 = arith.cmpi eq, %arg1, %c0_i32 : i32
    %1 = arith.extui %0 : i1 to i32
    %c0_i32_0 = arith.constant 0 : i32
    %2 = arith.cmpi ne, %1, %c0_i32_0 : i32
    scf.if %2 {
      %c0_10 = arith.constant 0 : index
      %c0_11 = arith.constant 0 : index
      %12 = vector.load %arg4[%c0_10, %c0_11] : memref<24x1xf32, #tpu.memory_space<vmem>>, vector<24x1xf32>
      %13 = vector.shape_cast %12 : vector<24x1xf32> to vector<24x1xf32>
      %14 = vector.broadcast %13 : vector<24x1xf32> to vector<24x2xf32>
      %c0_12 = arith.constant 0 : index
      %c0_13 = arith.constant 0 : index
      %15 = vector.load %arg7[%c0_12, %c0_13] : memref<24x2xf32, #tpu.memory_space<vmem>>, vector<24x2xf32>
      tpu.vector_store %arg7[%c0_12, %c0_13], %14 {strides = array<i32>} : memref<24x2xf32, #tpu.memory_space<vmem>>, vector<24x2xf32>,
    } else {
    }
    %c0 = arith.constant 0 : index
    %c0_1 = arith.constant 0 : index
    %3 = vector.load %arg7[%c0, %c0_1] : memref<24x2xf32, #tpu.memory_space<vmem>>, vector<24x2xf32>
    %c0_2 = arith.constant 0 : index
    %c0_3 = arith.constant 0 : index
    %4 = vector.load %arg3[%c0_2, %c0_3] : memref<24x1024xbf16, #tpu.memory_space<vmem>>, vector<24x1024xbf16>
    %c0_4 = arith.constant 0 : index
    %c0_5 = arith.constant 0 : index
    %5 = vector.load %arg2[%c0_4, %c0_5] : memref<1024x2xbf16, #tpu.memory_space<vmem>>, vector<1024x2xbf16>
    %cst = arith.constant dense<0.000000e+00> : vector<24x2xf32>
    %6 = tpu.matmul %4, %5, %cst {dimension_numbers = #tpu.dot_dimension_numbers<[1], [0], [0], [1], [0, 0, 1, 1], [], []>} : vector<24x1024xbf16>, vector<1024x2xbf16>, vector<24x2xf32> -> vector<24x2xf32>
    %7 = arith.addf %3, %6 : vector<24x2xf32>
    %c0_6 = arith.constant 0 : index
    %c0_7 = arith.constant 0 : index
    %8 = vector.load %arg7[%c0_6, %c0_7] : memref<24x2xf32, #tpu.memory_space<vmem>>, vector<24x2xf32>
    tpu.vector_store %arg7[%c0_6, %c0_7], %7 {strides = array<i32>} : memref<24x2xf32, #tpu.memory_space<vmem>>, vector<24x2xf32>,
    %c0_i32_8 = arith.constant 0 : i32
    %9 = arith.cmpi eq, %arg1, %c0_i32_8 : i32
    %10 = arith.extui %9 : i1 to i32
    %c0_i32_9 = arith.constant 0 : i32
    %11 = arith.cmpi ne, %10, %c0_i32_9 : i32
    scf.if %11 {
      %c0_10 = arith.constant 0 : index
      %c0_11 = arith.constant 0 : index
      %12 = vector.load %arg7[%c0_10, %c0_11] : memref<24x2xf32, #tpu.memory_space<vmem>>, vector<24x2xf32>
      %13 = vector.extract_strided_slice %12 {offsets = [0, 0], sizes = [8, 2], strides = [1, 1]} : vector<24x2xf32> to vector<8x2xf32>
      %cst_12 = arith.constant dense<0xFF800000> : vector<2xf32>
      %14 = vector.multi_reduction <maximumf>, %13, %cst_12 [0] : vector<8x2xf32> to vector<2xf32>
      %15 = vector.shape_cast %14 : vector<2xf32> to vector<1x2xf32>
      %16 = vector.broadcast %15 : vector<1x2xf32> to vector<8x2xf32>
      %17 = arith.subf %13, %16 : vector<8x2xf32>
      %cst_13 = arith.constant 1.000000e+00 : f32
      %18 = vector.broadcast %cst_13 : f32 to vector<8x2xf32>
      %19 = arith.mulf %17, %18 : vector<8x2xf32>
      %20 = math.exp %19 : vector<8x2xf32>
      %cst_14 = arith.constant dense<0.000000e+00> : vector<2xf32>
      %21 = vector.multi_reduction <add>, %20, %cst_14 [0] : vector<8x2xf32> to vector<2xf32>
      %22 = vector.shape_cast %21 : vector<2xf32> to vector<1x2xf32>
      %23 = tpu.reciprocal %22 {approx = true} : vector<1x2xf32> -> vector<1x2xf32>
      %24 = vector.broadcast %23 : vector<1x2xf32> to vector<8x2xf32>
      %25 = arith.mulf %20, %24 : vector<8x2xf32>
      %26 = arith.mulf %20, %20 : vector<8x2xf32>
      %27 = arith.mulf %26, %26 : vector<8x2xf32>
      %28 = arith.mulf %27, %20 : vector<8x2xf32>
      %cst_15 = arith.constant dense<0.000000e+00> : vector<2xf32>
      %29 = vector.multi_reduction <add>, %28, %cst_15 [0] : vector<8x2xf32> to vector<2xf32>
      %30 = vector.shape_cast %29 : vector<2xf32> to vector<1x2xf32>
      %cst_16 = arith.constant 1.000000e+00 : f32
      %31 = vector.broadcast %cst_16 : f32 to vector<1x2xf32>
      %32 = arith.divf %31, %30 : vector<1x2xf32>
      %33 = math.log %22 : vector<1x2xf32>
      %34 = arith.mulf %25, %19 : vector<8x2xf32>
      %cst_17 = arith.constant dense<0.000000e+00> : vector<2xf32>
      %35 = vector.multi_reduction <add>, %34, %cst_17 [0] : vector<8x2xf32> to vector<2xf32>
      %36 = vector.shape_cast %35 : vector<2xf32> to vector<1x2xf32>
      %37 = arith.subf %33, %36 : vector<1x2xf32>
      %38 = vector.extract_strided_slice %12 {offsets = [8, 0], sizes = [8, 2], strides = [1, 1]} : vector<24x2xf32> to vector<8x2xf32>
      %cst_18 = arith.constant dense<0xFF800000> : vector<2xf32>
      %39 = vector.multi_reduction <maximumf>, %38, %cst_18 [0] : vector<8x2xf32> to vector<2xf32>
      %40 = vector.shape_cast %39 : vector<2xf32> to vector<1x2xf32>
      %41 = vector.broadcast %40 : vector<1x2xf32> to vector<8x2xf32>
      %42 = arith.subf %38, %41 : vector<8x2xf32>
      %cst_19 = arith.constant 1.000000e+00 : f32
      %43 = vector.broadcast %cst_19 : f32 to vector<8x2xf32>
      %44 = arith.mulf %42, %43 : vector<8x2xf32>
      %45 = math.exp %44 : vector<8x2xf32>
      %cst_20 = arith.constant dense<0.000000e+00> : vector<2xf32>
      %46 = vector.multi_reduction <add>, %45, %cst_20 [0] : vector<8x2xf32> to vector<2xf32>
      %47 = vector.shape_cast %46 : vector<2xf32> to vector<1x2xf32>
      %48 = tpu.reciprocal %47 {approx = true} : vector<1x2xf32> -> vector<1x2xf32>
      %49 = vector.broadcast %48 : vector<1x2xf32> to vector<8x2xf32>
      %50 = arith.mulf %45, %49 : vector<8x2xf32>
      %51 = arith.mulf %45, %45 : vector<8x2xf32>
      %52 = arith.mulf %51, %51 : vector<8x2xf32>
      %53 = arith.mulf %52, %45 : vector<8x2xf32>
      %cst_21 = arith.constant dense<0.000000e+00> : vector<2xf32>
      %54 = vector.multi_reduction <add>, %53, %cst_21 [0] : vector<8x2xf32> to vector<2xf32>
      %55 = vector.shape_cast %54 : vector<2xf32> to vector<1x2xf32>
      %cst_22 = arith.constant 1.000000e+00 : f32
      %56 = vector.broadcast %cst_22 : f32 to vector<1x2xf32>
      %57 = arith.divf %56, %55 : vector<1x2xf32>
      %58 = math.log %47 : vector<1x2xf32>
      %59 = arith.mulf %50, %44 : vector<8x2xf32>
      %cst_23 = arith.constant dense<0.000000e+00> : vector<2xf32>
      %60 = vector.multi_reduction <add>, %59, %cst_23 [0] : vector<8x2xf32> to vector<2xf32>
      %61 = vector.shape_cast %60 : vector<2xf32> to vector<1x2xf32>
      %62 = arith.subf %58, %61 : vector<1x2xf32>
      %63 = vector.extract_strided_slice %12 {offsets = [16, 0], sizes = [8, 2], strides = [1, 1]} : vector<24x2xf32> to vector<8x2xf32>
      %cst_24 = arith.constant dense<0xFF800000> : vector<2xf32>
      %64 = vector.multi_reduction <maximumf>, %63, %cst_24 [0] : vector<8x2xf32> to vector<2xf32>
      %65 = vector.shape_cast %64 : vector<2xf32> to vector<1x2xf32>
      %66 = vector.broadcast %65 : vector<1x2xf32> to vector<8x2xf32>
      %67 = arith.subf %63, %66 : vector<8x2xf32>
      %cst_25 = arith.constant 1.000000e+00 : f32
      %68 = vector.broadcast %cst_25 : f32 to vector<8x2xf32>
      %69 = arith.mulf %67, %68 : vector<8x2xf32>
      %70 = math.exp %69 : vector<8x2xf32>
      %cst_26 = arith.constant dense<0.000000e+00> : vector<2xf32>
      %71 = vector.multi_reduction <add>, %70, %cst_26 [0] : vector<8x2xf32> to vector<2xf32>
      %72 = vector.shape_cast %71 : vector<2xf32> to vector<1x2xf32>
      %73 = tpu.reciprocal %72 {approx = true} : vector<1x2xf32> -> vector<1x2xf32>
      %74 = vector.broadcast %73 : vector<1x2xf32> to vector<8x2xf32>
      %75 = arith.mulf %70, %74 : vector<8x2xf32>
      %76 = arith.mulf %70, %70 : vector<8x2xf32>
      %77 = arith.mulf %76, %76 : vector<8x2xf32>
      %78 = arith.mulf %77, %70 : vector<8x2xf32>
      %cst_27 = arith.constant dense<0.000000e+00> : vector<2xf32>
      %79 = vector.multi_reduction <add>, %78, %cst_27 [0] : vector<8x2xf32> to vector<2xf32>
      %80 = vector.shape_cast %79 : vector<2xf32> to vector<1x2xf32>
      %cst_28 = arith.constant 1.000000e+00 : f32
      %81 = vector.broadcast %cst_28 : f32 to vector<1x2xf32>
      %82 = arith.divf %81, %80 : vector<1x2xf32>
      %83 = math.log %72 : vector<1x2xf32>
      %84 = arith.mulf %75, %69 : vector<8x2xf32>
      %cst_29 = arith.constant dense<0.000000e+00> : vector<2xf32>
      %85 = vector.multi_reduction <add>, %84, %cst_29 [0] : vector<8x2xf32> to vector<2xf32>
      %86 = vector.shape_cast %85 : vector<2xf32> to vector<1x2xf32>
      %87 = arith.subf %83, %86 : vector<1x2xf32>
      %88 = arith.addf %25, %50 : vector<8x2xf32>
      %89 = arith.addf %88, %75 : vector<8x2xf32>
      %cst_30 = arith.constant 0.333333343 : f32
      %90 = vector.broadcast %cst_30 : f32 to vector<8x2xf32>
      %91 = arith.mulf %89, %90 : vector<8x2xf32>
      %cst_31 = arith.constant 0.48089835 : f32
      %92 = vector.broadcast %cst_31 : f32 to vector<1x2xf32>
      %93 = arith.mulf %37, %92 : vector<1x2xf32>
      %cst_32 = arith.constant -2.000000e+00 : f32
      %94 = vector.broadcast %cst_32 : f32 to vector<1x2xf32>
      %95 = arith.mulf %94, %93 : vector<1x2xf32>
      %96 = math.exp %95 : vector<1x2xf32>
      %97 = arith.mulf %32, %32 : vector<1x2xf32>
      %98 = arith.mulf %97, %97 : vector<1x2xf32>
      %99 = arith.subf %25, %91 : vector<8x2xf32>
      %100 = math.absf %99 : vector<8x2xf32>
      %cst_33 = arith.constant dense<0.000000e+00> : vector<2xf32>
      %101 = vector.multi_reduction <add>, %100, %cst_33 [0] : vector<8x2xf32> to vector<2xf32>
      %102 = vector.shape_cast %101 : vector<2xf32> to vector<1x2xf32>
      %cst_34 = arith.constant 1.250000e-01 : f32
      %103 = vector.broadcast %cst_34 : f32 to vector<1x2xf32>
      %104 = arith.mulf %102, %103 : vector<1x2xf32>
      %cst_35 = arith.constant 1.000000e+00 : f32
      %105 = vector.broadcast %cst_35 : f32 to vector<1x2xf32>
      %106 = arith.subf %105, %104 : vector<1x2xf32>
      %107 = arith.mulf %106, %106 : vector<1x2xf32>
      %108 = arith.mulf %107, %106 : vector<1x2xf32>
      %cst_36 = arith.constant dense<0xFF800000> : vector<2xf32>
      %109 = vector.multi_reduction <maximumf>, %100, %cst_36 [0] : vector<8x2xf32> to vector<2xf32>
      %110 = vector.shape_cast %109 : vector<2xf32> to vector<1x2xf32>
      %111 = arith.mulf %110, %32 : vector<1x2xf32>
      %112 = arith.mulf %111, %111 : vector<1x2xf32>
      %cst_37 = arith.constant 0.000000e+00 : f32
      %113 = vector.broadcast %cst_37 : f32 to vector<1x2xf32>
      %114 = arith.subf %113, %37 : vector<1x2xf32>
      %115 = math.exp %114 : vector<1x2xf32>
      %116 = arith.mulf %115, %32 : vector<1x2xf32>
      %cst_38 = arith.constant 1.500000e-01 : f32
      %117 = vector.broadcast %cst_38 : f32 to vector<1x2xf32>
      %118 = arith.mulf %117, %96 : vector<1x2xf32>
      %cst_39 = arith.constant 4.000000e-01 : f32
      %119 = vector.broadcast %cst_39 : f32 to vector<1x2xf32>
      %120 = arith.mulf %119, %98 : vector<1x2xf32>
      %121 = arith.addf %118, %120 : vector<1x2xf32>
      %cst_40 = arith.constant 2.500000e-01 : f32
      %122 = vector.broadcast %cst_40 : f32 to vector<1x2xf32>
      %123 = arith.mulf %122, %108 : vector<1x2xf32>
      %124 = arith.addf %121, %123 : vector<1x2xf32>
      %cst_41 = arith.constant 1.000000e-01 : f32
      %125 = vector.broadcast %cst_41 : f32 to vector<1x2xf32>
      %126 = arith.mulf %125, %112 : vector<1x2xf32>
      %127 = arith.addf %124, %126 : vector<1x2xf32>
      %cst_42 = arith.constant 1.000000e-01 : f32
      %128 = vector.broadcast %cst_42 : f32 to vector<1x2xf32>
      %129 = arith.mulf %128, %116 : vector<1x2xf32>
      %130 = arith.addf %127, %129 : vector<1x2xf32>
      %cst_43 = arith.constant 5.000000e-01 : f32
      %131 = vector.broadcast %cst_43 : f32 to vector<1x2xf32>
      %132 = arith.subf %93, %131 : vector<1x2xf32>
      %cst_44 = arith.constant 0.000000e+00 : f32
      %133 = vector.broadcast %cst_44 : f32 to vector<1x2xf32>
      %134 = arith.maximumf %132, %133 : vector<1x2xf32>
      %cst_45 = arith.constant 0.000000e+00 : f32
      %135 = vector.broadcast %cst_45 : f32 to vector<1x2xf32>
      %136 = arith.subf %135, %134 : vector<1x2xf32>
      %cst_46 = arith.constant 5.000000e-01 : f32
      %137 = vector.broadcast %cst_46 : f32 to vector<1x2xf32>
      %138 = arith.mulf %136, %137 : vector<1x2xf32>
      %139 = math.exp %138 : vector<1x2xf32>
      %cst_47 = arith.constant 1.000000e-01 : f32
      %140 = vector.broadcast %cst_47 : f32 to vector<1x2xf32>
      %141 = arith.mulf %140, %139 : vector<1x2xf32>
      %cst_48 = arith.constant 0.899999976 : f32
      %142 = vector.broadcast %cst_48 : f32 to vector<1x2xf32>
      %143 = arith.addf %142, %141 : vector<1x2xf32>
      %144 = arith.mulf %130, %143 : vector<1x2xf32>
      %c0_49 = arith.constant 0 : index
      %145 = memref.load %arg5[%c0_49] : memref<3xf32, #tpu.memory_space<smem>>
      %146 = vector.broadcast %145 : f32 to vector<1x2xf32>
      %147 = arith.mulf %146, %144 : vector<1x2xf32>
      %cst_50 = arith.constant 0.48089835 : f32
      %148 = vector.broadcast %cst_50 : f32 to vector<1x2xf32>
      %149 = arith.mulf %62, %148 : vector<1x2xf32>
      %cst_51 = arith.constant -2.000000e+00 : f32
      %150 = vector.broadcast %cst_51 : f32 to vector<1x2xf32>
      %151 = arith.mulf %150, %149 : vector<1x2xf32>
      %152 = math.exp %151 : vector<1x2xf32>
      %153 = arith.mulf %57, %57 : vector<1x2xf32>
      %154 = arith.mulf %153, %153 : vector<1x2xf32>
      %155 = arith.subf %50, %91 : vector<8x2xf32>
      %156 = math.absf %155 : vector<8x2xf32>
      %cst_52 = arith.constant dense<0.000000e+00> : vector<2xf32>
      %157 = vector.multi_reduction <add>, %156, %cst_52 [0] : vector<8x2xf32> to vector<2xf32>
      %158 = vector.shape_cast %157 : vector<2xf32> to vector<1x2xf32>
      %cst_53 = arith.constant 1.250000e-01 : f32
      %159 = vector.broadcast %cst_53 : f32 to vector<1x2xf32>
      %160 = arith.mulf %158, %159 : vector<1x2xf32>
      %cst_54 = arith.constant 1.000000e+00 : f32
      %161 = vector.broadcast %cst_54 : f32 to vector<1x2xf32>
      %162 = arith.subf %161, %160 : vector<1x2xf32>
      %163 = arith.mulf %162, %162 : vector<1x2xf32>
      %164 = arith.mulf %163, %162 : vector<1x2xf32>
      %cst_55 = arith.constant dense<0xFF800000> : vector<2xf32>
      %165 = vector.multi_reduction <maximumf>, %156, %cst_55 [0] : vector<8x2xf32> to vector<2xf32>
      %166 = vector.shape_cast %165 : vector<2xf32> to vector<1x2xf32>
      %167 = arith.mulf %166, %57 : vector<1x2xf32>
      %168 = arith.mulf %167, %167 : vector<1x2xf32>
      %cst_56 = arith.constant 0.000000e+00 : f32
      %169 = vector.broadcast %cst_56 : f32 to vector<1x2xf32>
      %170 = arith.subf %169, %62 : vector<1x2xf32>
      %171 = math.exp %170 : vector<1x2xf32>
      %172 = arith.mulf %171, %57 : vector<1x2xf32>
      %cst_57 = arith.constant 1.500000e-01 : f32
      %173 = vector.broadcast %cst_57 : f32 to vector<1x2xf32>
      %174 = arith.mulf %173, %152 : vector<1x2xf32>
      %cst_58 = arith.constant 4.000000e-01 : f32
      %175 = vector.broadcast %cst_58 : f32 to vector<1x2xf32>
      %176 = arith.mulf %175, %154 : vector<1x2xf32>
      %177 = arith.addf %174, %176 : vector<1x2xf32>
      %cst_59 = arith.constant 2.500000e-01 : f32
      %178 = vector.broadcast %cst_59 : f32 to vector<1x2xf32>
      %179 = arith.mulf %178, %164 : vector<1x2xf32>
      %180 = arith.addf %177, %179 : vector<1x2xf32>
      %cst_60 = arith.constant 1.000000e-01 : f32
      %181 = vector.broadcast %cst_60 : f32 to vector<1x2xf32>
      %182 = arith.mulf %181, %168 : vector<1x2xf32>
      %183 = arith.addf %180, %182 : vector<1x2xf32>
      %cst_61 = arith.constant 1.000000e-01 : f32
      %184 = vector.broadcast %cst_61 : f32 to vector<1x2xf32>
      %185 = arith.mulf %184, %172 : vector<1x2xf32>
      %186 = arith.addf %183, %185 : vector<1x2xf32>
      %cst_62 = arith.constant 5.000000e-01 : f32
      %187 = vector.broadcast %cst_62 : f32 to vector<1x2xf32>
      %188 = arith.subf %149, %187 : vector<1x2xf32>
      %cst_63 = arith.constant 0.000000e+00 : f32
      %189 = vector.broadcast %cst_63 : f32 to vector<1x2xf32>
      %190 = arith.maximumf %188, %189 : vector<1x2xf32>
      %cst_64 = arith.constant 0.000000e+00 : f32
      %191 = vector.broadcast %cst_64 : f32 to vector<1x2xf32>
      %192 = arith.subf %191, %190 : vector<1x2xf32>
      %cst_65 = arith.constant 5.000000e-01 : f32
      %193 = vector.broadcast %cst_65 : f32 to vector<1x2xf32>
      %194 = arith.mulf %192, %193 : vector<1x2xf32>
      %195 = math.exp %194 : vector<1x2xf32>
      %cst_66 = arith.constant 1.000000e-01 : f32
      %196 = vector.broadcast %cst_66 : f32 to vector<1x2xf32>
      %197 = arith.mulf %196, %195 : vector<1x2xf32>
      %cst_67 = arith.constant 0.899999976 : f32
      %198 = vector.broadcast %cst_67 : f32 to vector<1x2xf32>
      %199 = arith.addf %198, %197 : vector<1x2xf32>
      %200 = arith.mulf %186, %199 : vector<1x2xf32>
      %c1 = arith.constant 1 : index
      %201 = memref.load %arg5[%c1] : memref<3xf32, #tpu.memory_space<smem>>
      %202 = vector.broadcast %201 : f32 to vector<1x2xf32>
      %203 = arith.mulf %202, %200 : vector<1x2xf32>
      %cst_68 = arith.constant 0.48089835 : f32
      %204 = vector.broadcast %cst_68 : f32 to vector<1x2xf32>
      %205 = arith.mulf %87, %204 : vector<1x2xf32>
      %cst_69 = arith.constant -2.000000e+00 : f32
      %206 = vector.broadcast %cst_69 : f32 to vector<1x2xf32>
      %207 = arith.mulf %206, %205 : vector<1x2xf32>
      %208 = math.exp %207 : vector<1x2xf32>
      %209 = arith.mulf %82, %82 : vector<1x2xf32>
      %210 = arith.mulf %209, %209 : vector<1x2xf32>
      %211 = arith.subf %75, %91 : vector<8x2xf32>
      %212 = math.absf %211 : vector<8x2xf32>
      %cst_70 = arith.constant dense<0.000000e+00> : vector<2xf32>
      %213 = vector.multi_reduction <add>, %212, %cst_70 [0] : vector<8x2xf32> to vector<2xf32>
      %214 = vector.shape_cast %213 : vector<2xf32> to vector<1x2xf32>
      %cst_71 = arith.constant 1.250000e-01 : f32
      %215 = vector.broadcast %cst_71 : f32 to vector<1x2xf32>
      %216 = arith.mulf %214, %215 : vector<1x2xf32>
      %cst_72 = arith.constant 1.000000e+00 : f32
      %217 = vector.broadcast %cst_72 : f32 to vector<1x2xf32>
      %218 = arith.subf %217, %216 : vector<1x2xf32>
      %219 = arith.mulf %218, %218 : vector<1x2xf32>
      %220 = arith.mulf %219, %218 : vector<1x2xf32>
      %cst_73 = arith.constant dense<0xFF800000> : vector<2xf32>
      %221 = vector.multi_reduction <maximumf>, %212, %cst_73 [0] : vector<8x2xf32> to vector<2xf32>
      %222 = vector.shape_cast %221 : vector<2xf32> to vector<1x2xf32>
      %223 = arith.mulf %222, %82 : vector<1x2xf32>
      %224 = arith.mulf %223, %223 : vector<1x2xf32>
      %cst_74 = arith.constant 0.000000e+00 : f32
      %225 = vector.broadcast %cst_74 : f32 to vector<1x2xf32>
      %226 = arith.subf %225, %87 : vector<1x2xf32>
      %227 = math.exp %226 : vector<1x2xf32>
      %228 = arith.mulf %227, %82 : vector<1x2xf32>
      %cst_75 = arith.constant 1.500000e-01 : f32
      %229 = vector.broadcast %cst_75 : f32 to vector<1x2xf32>
      %230 = arith.mulf %229, %208 : vector<1x2xf32>
      %cst_76 = arith.constant 4.000000e-01 : f32
      %231 = vector.broadcast %cst_76 : f32 to vector<1x2xf32>
      %232 = arith.mulf %231, %210 : vector<1x2xf32>
      %233 = arith.addf %230, %232 : vector<1x2xf32>
      %cst_77 = arith.constant 2.500000e-01 : f32
      %234 = vector.broadcast %cst_77 : f32 to vector<1x2xf32>
      %235 = arith.mulf %234, %220 : vector<1x2xf32>
      %236 = arith.addf %233, %235 : vector<1x2xf32>
      %cst_78 = arith.constant 1.000000e-01 : f32
      %237 = vector.broadcast %cst_78 : f32 to vector<1x2xf32>
      %238 = arith.mulf %237, %224 : vector<1x2xf32>
      %239 = arith.addf %236, %238 : vector<1x2xf32>
      %cst_79 = arith.constant 1.000000e-01 : f32
      %240 = vector.broadcast %cst_79 : f32 to vector<1x2xf32>
      %241 = arith.mulf %240, %228 : vector<1x2xf32>
      %242 = arith.addf %239, %241 : vector<1x2xf32>
      %cst_80 = arith.constant 5.000000e-01 : f32
      %243 = vector.broadcast %cst_80 : f32 to vector<1x2xf32>
      %244 = arith.subf %205, %243 : vector<1x2xf32>
      %cst_81 = arith.constant 0.000000e+00 : f32
      %245 = vector.broadcast %cst_81 : f32 to vector<1x2xf32>
      %246 = arith.maximumf %244, %245 : vector<1x2xf32>
      %cst_82 = arith.constant 0.000000e+00 : f32
      %247 = vector.broadcast %cst_82 : f32 to vector<1x2xf32>
      %248 = arith.subf %247, %246 : vector<1x2xf32>
      %cst_83 = arith.constant 5.000000e-01 : f32
      %249 = vector.broadcast %cst_83 : f32 to vector<1x2xf32>
      %250 = arith.mulf %248, %249 : vector<1x2xf32>
      %251 = math.exp %250 : vector<1x2xf32>
      %cst_84 = arith.constant 1.000000e-01 : f32
      %252 = vector.broadcast %cst_84 : f32 to vector<1x2xf32>
      %253 = arith.mulf %252, %251 : vector<1x2xf32>
      %cst_85 = arith.constant 0.899999976 : f32
      %254 = vector.broadcast %cst_85 : f32 to vector<1x2xf32>
      %255 = arith.addf %254, %253 : vector<1x2xf32>
      %256 = arith.mulf %242, %255 : vector<1x2xf32>
      %c2 = arith.constant 2 : index
      %257 = memref.load %arg5[%c2] : memref<3xf32, #tpu.memory_space<smem>>
      %258 = vector.broadcast %257 : f32 to vector<1x2xf32>
      %259 = arith.mulf %258, %256 : vector<1x2xf32>
      %260 = arith.addf %147, %203 : vector<1x2xf32>
      %261 = arith.addf %260, %259 : vector<1x2xf32>
      %cst_86 = arith.constant 1.000000e-10 : f32
      %262 = vector.broadcast %cst_86 : f32 to vector<1x2xf32>
      %263 = arith.addf %261, %262 : vector<1x2xf32>
      %cst_87 = arith.constant 1.000000e+00 : f32
      %264 = vector.broadcast %cst_87 : f32 to vector<1x2xf32>
      %265 = arith.divf %264, %263 : vector<1x2xf32>
      %266 = vector.broadcast %147 : vector<1x2xf32> to vector<8x2xf32>
      %267 = arith.mulf %266, %25 : vector<8x2xf32>
      %268 = vector.broadcast %203 : vector<1x2xf32> to vector<8x2xf32>
      %269 = arith.mulf %268, %50 : vector<8x2xf32>
      %270 = arith.addf %267, %269 : vector<8x2xf32>
      %271 = vector.broadcast %259 : vector<1x2xf32> to vector<8x2xf32>
      %272 = arith.mulf %271, %75 : vector<8x2xf32>
      %273 = arith.addf %270, %272 : vector<8x2xf32>
      %274 = vector.broadcast %265 : vector<1x2xf32> to vector<8x2xf32>
      %275 = arith.mulf %273, %274 : vector<8x2xf32>
      %cst_88 = arith.constant 1.05263162 : f32
      %276 = vector.broadcast %cst_88 : f32 to vector<8x2xf32>
      %277 = arith.mulf %275, %276 : vector<8x2xf32>
      %cst_89 = arith.constant dense<0xFF800000> : vector<2xf32>
      %278 = vector.multi_reduction <maximumf>, %277, %cst_89 [0] : vector<8x2xf32> to vector<2xf32>
      %279 = vector.shape_cast %278 : vector<2xf32> to vector<1x2xf32>
      %280 = vector.broadcast %279 : vector<1x2xf32> to vector<8x2xf32>
      %281 = arith.subf %277, %280 : vector<8x2xf32>
      %282 = math.exp %281 : vector<8x2xf32>
      %cst_90 = arith.constant dense<0.000000e+00> : vector<2xf32>
      %283 = vector.multi_reduction <add>, %282, %cst_90 [0] : vector<8x2xf32> to vector<2xf32>
      %284 = vector.shape_cast %283 : vector<2xf32> to vector<1x2xf32>
      %285 = vector.broadcast %284 : vector<1x2xf32> to vector<8x2xf32>
      %286 = arith.divf %282, %285 : vector<8x2xf32>
      %c0_91 = arith.constant 0 : index
      %c0_92 = arith.constant 0 : index
      %287 = vector.load %arg6[%c0_91, %c0_92] : memref<8x2xf32, #tpu.memory_space<vmem>>, vector<8x2xf32>
      tpu.vector_store %arg6[%c0_91, %c0_92], %286 {strides = array<i32>} : memref<8x2xf32, #tpu.memory_space<vmem>>, vector<8x2xf32>,
    } else {
    }
    return
  }
  func.func @transform_0(%arg0: i32, %arg1: i32) -> (i32, i32) {
    %c0_i32 = arith.constant 0 : i32
    return %arg1, %arg0 : i32, i32
  }
  func.func @transform_1(%arg0: i32, %arg1: i32) -> (i32, i32) {
    %c0_i32 = arith.constant 0 : i32
    %c0_i32_0 = arith.constant 0 : i32
    return %c0_i32, %arg1 : i32, i32
  }
  func.func @transform_2(%arg0: i32, %arg1: i32) -> (i32, i32) {
    %c0_i32 = arith.constant 0 : i32
    %c0_i32_0 = arith.constant 0 : i32
    %c0_i32_1 = arith.constant 0 : i32
    return %c0_i32, %c0_i32_0 : i32, i32
  }
  func.func @transform_3(%arg0: i32, %arg1: i32) -> i32 {
    %c0_i32 = arith.constant 0 : i32
    %c0_i32_0 = arith.constant 0 : i32
    return %c0_i32 : i32
  }
  func.func @transform_4(%arg0: i32, %arg1: i32) -> (i32, i32) {
    %c0_i32 = arith.constant 0 : i32
    %c0_i32_0 = arith.constant 0 : i32
    return %c0_i32, %arg0 : i32, i32
  }
}

</mosaic_0001>

<bundles_post_ra>
// kernel: tpu_custom_call.1
= control target key start
LH: loop header
LB: loop body
LE: loop exit
PB: predicated region body
PF: predicated region fallthrough
CT: control target
= control target key end

     0   :  { %9 = vsyncpa [#allocation4], 0  ;;  %s1866_s0 = inlined_call_operand.vmem [shape: bf16[1024,2], index: 0, kind: input, shape index: {}]   ;;  %s1867_s1 = inlined_call_operand.vmem [shape: bf16[24,1024], index: 1, kind: input, shape index: {}]   ;;  %s1868_s2 = inlined_call_operand.vmem [shape: f32[24,1], index: 2, kind: input, shape index: {}]   ;;  %s1869_s3 = inlined_call_operand.vmem [shape: f32[3], index: 3, kind: input, shape index: {}]   ;;  %s1870_s4 = inlined_call_operand.vmem [shape: f32[8,2], index: 4, kind: output, shape index: {}]  }
   0x1   :  { %s22_s17 = sshll.u32 %s1869_s3, 4  ;;  %s23_s17 = int_to_ptr.vmem [resolvable:$true] %s22_s17 }
   0x2   :  { %s1503_s18 = scalar_lea.vmem %s23_s17, 16  ;;  %p1508_p1 = scmp.lt.s32.totalorder %s23_s17, %s23_s17 }
   0x3   :  { %p1504_p0 = scmp.ne.s32.totalorder %s23_s17, %s1503_s18  ;;  %p1509_p2 = scmp.lt.s32.totalorder %s1503_s18, %s1503_s18 }
   0x5   :  { %p1510_p3 = por %p1509_p2, %p1508_p1 }
   0x7   :  { %p1511_p4 = pnand %p1510_p3, %p1504_p0 }
   0x9   :  { %1514 = shalt.err (!%p1511_p4)
}
   0xa   :  { %s1517_s19 = smov [#allocation3]  }
   0xb   :  { %25 = dma.vmem_to_smem %s23_s17, 16, %s1517_s19, [#allocation4]  }
   0xc   :  { %1515 = dma.done.wait [#allocation4], 16  }
   0xd   :  { %1516 = vsyncadd [#allocation4], 4294967280 }
   0xe   :  { %29 = sfence }
   0xf   :  { %v1383_v0 = vld [vmem:[%s1866_s0 + $0x40] sm:$0xff]   ;;  %v1518_v2 = vmov 0   ;;  %v1387_v5 = vld [vmem:[%s1866_s0 + $0x48] sm:$0xff]   ;;  %v1391_v9 = vld [vmem:[%s1866_s0 + $0x50] sm:$0xff]   ;;  %vm53_vm0 = vcmask 15360   ;;  %s1266_s15 = sld [smem:[#allocation3 + $0x2]] }
  0x10   :  { %v1384_v1 = vld [vmem:[%s1866_s0 + $0xc0] sm:$0xff]   ;;  %1381 = vset.pattern.permute.xlu0 %v1518_v2  ;;  %1382 = vset.pattern.permute.xlu1 %v1518_v2  ;;  %v1388_v6 = vld [vmem:[%s1866_s0 + $0xc8] sm:$0xff]   ;;  %v1392_v10 = vld [vmem:[%s1866_s0 + $0xd0] sm:$0xff]  }
  0x11   :  { %1267 = vmatprep.subr.bf16.mxu0 %v1383_v0  ;;  %v1385_v3 = vld [vmem:[%s1866_s0] sm:$0xff]   ;;  %1295 = vmatprep.subr.bf16.mxu1 %v1384_v1  ;;  %v1389_v7 = vld [vmem:[%s1866_s0 + $0x8] sm:$0xff]   ;;  %v1393_v11 = vld [vmem:[%s1866_s0 + $0x10] sm:$0xff]  }
  0x12   :  { %v1386_v4 = vld [vmem:[%s1866_s0 + $0x80] sm:$0xff]   ;;  %1268 = vmatpush3.bf16.msra.mxu0 %v1385_v3  ;;  %v1390_v8 = vld [vmem:[%s1866_s0 + $0x88] sm:$0xff]   ;;  %v1394_v12 = vld [vmem:[%s1866_s0 + $0x90] sm:$0xff]  }
  0x13   :  { %1296 = vmatpush3.bf16.msra.mxu1 %v1386_v4  ;;  %1269 = vmatprep.subr.bf16.mxu0 %v1387_v5  ;;  %v1395_v13 = vld [vmem:[%s1866_s0 + $0x58] sm:$0xff]   ;;  %v1399_v17 = vld [vmem:[%s1866_s0 + $0x60] sm:$0xff]   ;;  %v1403_v21 = vld [vmem:[%s1866_s0 + $0x68] sm:$0xff]  }
  0x14   :  { %1297 = vmatprep.subr.bf16.mxu1 %v1388_v6  ;;  %v1396_v14 = vld [vmem:[%s1866_s0 + $0xd8] sm:$0xff]   ;;  %v1400_v18 = vld [vmem:[%s1866_s0 + $0xe0] sm:$0xff]   ;;  %v1404_v22 = vld [vmem:[%s1866_s0 + $0xe8] sm:$0xff]  }
  0x15   :  { %v1397_v15 = vld [vmem:[%s1866_s0 + $0x18] sm:$0xff]   ;;  %v1401_v19 = vld [vmem:[%s1866_s0 + $0x20] sm:$0xff]   ;;  %v1405_v23 = vld [vmem:[%s1866_s0 + $0x28] sm:$0xff]  }
  0x16   :  { %1270 = vmatpush3.bf16.msra.mxu0 %v1389_v7  ;;  %v1398_v16 = vld [vmem:[%s1866_s0 + $0x98] sm:$0xff]   ;;  %v1402_v20 = vld [vmem:[%s1866_s0 + $0xa0] sm:$0xff]   ;;  %v1406_v24 = vld [vmem:[%s1866_s0 + $0xa8] sm:$0xff]  }
  0x17   :  { %1298 = vmatpush3.bf16.msra.mxu1 %v1390_v8  ;;  %1271 = vmatprep.subr.bf16.mxu0 %v1391_v9  ;;  %v1407_v25 = vld [vmem:[%s1866_s0 + $0x70] sm:$0xff]   ;;  %v1411_v29 = vld [vmem:[%s1866_s0 + $0x78] sm:$0xff]   ;;  %v60_v33 = vld [vmem:[%s1867_s1] sm:$0xff] }
  0x18   :  { %1299 = vmatprep.subr.bf16.mxu1 %v1392_v10  ;;  %v1408_v26 = vld [vmem:[%s1866_s0 + $0xf0] sm:$0xff]   ;;  %v1412_v30 = vld [vmem:[%s1866_s0 + $0xf8] sm:$0xff]   ;;  %v64_v34 = vld [vmem:[%s1867_s1 + $0x20] sm:$0xff] }
  0x19   :  { %v1409_v27 = vld [vmem:[%s1866_s0 + $0x30] sm:$0xff]   ;;  %v1413_v31 = vld [vmem:[%s1866_s0 + $0x38] sm:$0xff]   ;;  %v61_v35 = vld [vmem:[%s1867_s1 + $0x8] sm:$0xff]  ;;  %v1182_v36 = vcombine.low %v60_v33, %v64_v34  ;;  %v1183_v37 = vcombine.high %v60_v33, %v64_v34 }
  0x1a   :  { %1272 = vmatpush3.bf16.msra.mxu0 %v1393_v11  ;;  %v1410_v28 = vld [vmem:[%s1866_s0 + $0xb0] sm:$0xff]   ;;  %v1414_v32 = vld [vmem:[%s1866_s0 + $0xb8] sm:$0xff]   ;;  %v65_v38 = vld [vmem:[%s1867_s1 + $0x28] sm:$0xff] }
  0x1b   :  { %1300 = vmatpush3.bf16.msra.mxu1 %v1394_v12  ;;  %1273 = vmatprep.subr.bf16.mxu0 %v1395_v13  ;;  %v1184_v39 = vcombine.low %v61_v35, %v65_v38  ;;  %v1185_v40 = vcombine.high %v61_v35, %v65_v38  ;;  %v1415_v41 = vld [vmem:[%s1866_s0 + $0x140] sm:$0xff]   ;;  %v1419_v45 = vld [vmem:[%s1866_s0 + $0x148] sm:$0xff]   ;;  %v1423_v49 = vld [vmem:[%s1866_s0 + $0x150] sm:$0xff]  }
  0x1c   :  { %1301 = vmatprep.subr.bf16.mxu1 %v1396_v14  ;;  %684 = vmatprep.mubr.bf16.mxu0 %v1183_v37  ;;  %v1416_v42 = vld [vmem:[%s1866_s0 + $0x1c0] sm:$0xff]   ;;  %v1420_v46 = vld [vmem:[%s1866_s0 + $0x1c8] sm:$0xff]   ;;  %v1424_v50 = vld [vmem:[%s1866_s0 + $0x1d0] sm:$0xff]  }
  0x1d   :  { %732 = vmatprep.mubr.bf16.mxu1 %v1185_v40  ;;  %v1417_v43 = vld [vmem:[%s1866_s0 + $0x100] sm:$0xff]   ;;  %v1421_v47 = vld [vmem:[%s1866_s0 + $0x108] sm:$0xff]   ;;  %v1425_v51 = vld [vmem:[%s1866_s0 + $0x110] sm:$0xff]  }
  0x1e   :  { %1274 = vmatpush3.bf16.msra.mxu0 %v1397_v15  ;;  %v1418_v44 = vld [vmem:[%s1866_s0 + $0x180] sm:$0xff]   ;;  %v1422_v48 = vld [vmem:[%s1866_s0 + $0x188] sm:$0xff]   ;;  %v1426_v52 = vld [vmem:[%s1866_s0 + $0x190] sm:$0xff]  }
  0x1f   :  { %1302 = vmatpush3.bf16.msra.mxu1 %v1398_v16  ;;  %1275 = vmatprep.subr.bf16.mxu0 %v1399_v17  ;;  %v1427_v53 = vld [vmem:[%s1866_s0 + $0x158] sm:$0xff]   ;;  %v1431_v57 = vld [vmem:[%s1866_s0 + $0x160] sm:$0xff]   ;;  %v1436_v63 = vld [vmem:[%s1866_s0 + $0x168] sm:$0xff]  }
  0x20   :  { %1303 = vmatprep.subr.bf16.mxu1 %v1400_v18  ;;  %v1428_v54 = vld [vmem:[%s1866_s0 + $0x1d8] sm:$0xff]   ;;  %v1432_v58 = vld [vmem:[%s1866_s0 + $0x1e0] sm:$0xff]   ;;  %v1437_v1 = vld [vmem:[%s1866_s0 + $0x1e8] sm:$0xff]  }
  0x21   :  { %v1429_v55 = vld [vmem:[%s1866_s0 + $0x118] sm:$0xff]   ;;  %v1433_v59 = vld [vmem:[%s1866_s0 + $0x120] sm:$0xff]   ;;  %v1439_v2 = vld [vmem:[%s1866_s0 + $0x128] sm:$0xff]  }
  0x22   :  { %1276 = vmatpush3.bf16.msra.mxu0 %v1401_v19  ;;  %v1430_v56 = vld [vmem:[%s1866_s0 + $0x198] sm:$0xff]   ;;  %v1434_v60 = vld [vmem:[%s1866_s0 + $0x1a0] sm:$0xff]   ;;  %v1440_v3 = vld [vmem:[%s1866_s0 + $0x1a8] sm:$0xff]  }
  0x23   :  { %1304 = vmatpush3.bf16.msra.mxu1 %v1402_v20  ;;  %1277 = vmatprep.subr.bf16.mxu0 %v1403_v21  ;;  %v68_v61 = vld [vmem:[%s1867_s1 + $0x40] sm:$0xff]  ;;  %v69_v4 = vld [vmem:[%s1867_s1 + $0x48] sm:$0xff]  ;;  %v1443_v7 = vld [vmem:[%s1866_s0 + $0x170] sm:$0xff]  }
  0x24   :  { %1305 = vmatprep.subr.bf16.mxu1 %v1404_v22  ;;  %v1191_v62 = vcombine.high %v68_v61, %v68_v61  ;;  %v1190_v0 = vcombine.low %v68_v61, %v68_v61  ;;  %v1193_v5 = vcombine.high %v69_v4, %v69_v4  ;;  %v1192_v6 = vcombine.low %v69_v4, %v69_v4  ;;  %v1444_v8 = vld [vmem:[%s1866_s0 + $0x1f0] sm:$0xff]   ;;  %v1447_v11 = vld [vmem:[%s1866_s0 + $0x178] sm:$0xff]  }
  0x25   :  { %v1445_v9 = vld [vmem:[%s1866_s0 + $0x130] sm:$0xff]   ;;  %v1448_v12 = vld [vmem:[%s1866_s0 + $0x1f8] sm:$0xff]  }
  0x26   :  { %1278 = vmatpush3.bf16.msra.mxu0 %v1405_v23  ;;  %v1446_v10 = vld [vmem:[%s1866_s0 + $0x1b0] sm:$0xff]   ;;  %v1449_v13 = vld [vmem:[%s1866_s0 + $0x138] sm:$0xff]  }
  0x27   :  { %1306 = vmatpush3.bf16.msra.mxu1 %v1406_v24  ;;  %1279 = vmatprep.subr.bf16.mxu0 %v1407_v25  ;;  %v1450_v14 = vld [vmem:[%s1866_s0 + $0x1b8] sm:$0xff]   ;;  %v62_v15 = vld [vmem:[%s1867_s1 + $0x10] sm:$0xff] }
  0x28   :  { %1307 = vmatprep.subr.bf16.mxu1 %v1408_v26  ;;  %v66_v16 = vld [vmem:[%s1867_s1 + $0x30] sm:$0xff]  ;;  %v63_v17 = vld [vmem:[%s1867_s1 + $0x18] sm:$0xff] }
  0x29   :  { %v1186_v18 = vcombine.low %v62_v15, %v66_v16  ;;  %v1187_v19 = vcombine.high %v62_v15, %v66_v16  ;;  %v67_v20 = vld [vmem:[%s1867_s1 + $0x38] sm:$0xff]  ;;  %v70_v21 = vld [vmem:[%s1867_s1 + $0x50] sm:$0xff] }
  0x2a   :  { %1280 = vmatpush3.bf16.msra.mxu0 %v1409_v27  ;;  %v71_v22 = vld [vmem:[%s1867_s1 + $0x58] sm:$0xff]  ;;  %v1188_v23 = vcombine.low %v63_v17, %v67_v20  ;;  %v1189_v24 = vcombine.high %v63_v17, %v67_v20  ;;  %v1195_v25 = vcombine.high %v70_v21, %v70_v21  ;;  %v35_v27 = vld [vmem:[%s1868_s2] sm:$0xff]  ;;  %s1036_s1 = sld [smem:[#allocation3]] }
  0x2b   :  { %1308 = vmatpush3.bf16.msra.mxu1 %v1410_v28  ;;  %1281 = vmatprep.subr.bf16.mxu0 %v1411_v29  ;;  %v1197_v26 = vcombine.high %v71_v22, %v71_v22  ;;  %v37_v28 = vld [vmem:[%s1868_s2 + $0x10] sm:$0xff]  ;;  %v36_v29 = vld [vmem:[%s1868_s2 + $0x8] sm:$0xff]  ;;  %s1264_s2 = sld [smem:[#allocation3 + $0x1]] }
  0x2c   :  { %1309 = vmatprep.subr.bf16.mxu1 %v1412_v30  ;;  %40 = vperm.xlu0 %1381, %v35_v27   ;;  %v1194_v30 = vcombine.low %v70_v21, %v70_v21 }
  0x2d   :  { %50 = vperm.xlu1 %1382, %v37_v28  }
  0x2e   :  { %1282 = vmatpush3.bf16.msra.mxu0 %v1413_v31  ;;  %v1196_v31 = vcombine.low %v71_v22, %v71_v22 }
  0x2f   :  { %1310 = vmatpush3.bf16.msra.mxu1 %v1414_v32  ;;  %1323 = vmatprep.subr.bf16.mxu0 %v1415_v41 }
  0x30   :  { %1351 = vmatprep.subr.bf16.mxu1 %v1416_v42  ;;  %45 = vperm.xlu0 %1381, %v36_v29  }
  0x31   :  { %685 = vmatmul.mubr.bf16.vlgmr.msra.gmra.mrb[0].mxu0 %v1182_v36 }
  0x32   :  { %733 = vmatmul.mubr.bf16.vlgmr.msra.gmra.mrb[0].mxu1 %v1184_v39  ;;  %1324 = vmatpush3.bf16.msra.mxu0 %v1417_v43 }
  0x33   :  { %1352 = vmatpush3.bf16.msra.mxu1 %v1418_v44  ;;  %1325 = vmatprep.subr.bf16.mxu0 %v1419_v45 }
  0x34   :  { %1353 = vmatprep.subr.bf16.mxu1 %v1420_v46  ;;  %692 = vmatprep.mubr.bf16.mxu0 %v1191_v62 }
  0x35   :  { %740 = vmatprep.mubr.bf16.mxu1 %v1193_v5 }
  0x36   :  { %1326 = vmatpush3.bf16.msra.mxu0 %v1421_v47 }
  0x37   :  { %1354 = vmatpush3.bf16.msra.mxu1 %v1422_v48  ;;  %1327 = vmatprep.subr.bf16.mxu0 %v1423_v49 }
  0x38   :  { %1355 = vmatprep.subr.bf16.mxu1 %v1424_v50 }
  0x39   :  { %693 = vmatmul.mubr.bf16.gmra.mrb[4].mxu0 %v1190_v0 }
  0x3a   :  { %1328 = vmatpush3.bf16.msra.mxu0 %v1425_v51  ;;  %741 = vmatmul.mubr.bf16.gmra.mrb[4].mxu1 %v1192_v6 }
  0x3b   :  { %1356 = vmatpush3.bf16.msra.mxu1 %v1426_v52  ;;  %1329 = vmatprep.subr.bf16.mxu0 %v1427_v53 }
  0x3c   :  { %1357 = vmatprep.subr.bf16.mxu1 %v1428_v54  ;;  %780 = vmatprep.mubr.bf16.mxu0 %v1187_v19 }
  0x3d   :  { %828 = vmatprep.mubr.bf16.mxu1 %v1189_v24 }
  0x3e   :  { %1330 = vmatpush3.bf16.msra.mxu0 %v1429_v55 }
  0x3f   :  { %1358 = vmatpush3.bf16.msra.mxu1 %v1430_v56  ;;  %1331 = vmatprep.subr.bf16.mxu0 %v1431_v57 }
  0x40   :  { %1359 = vmatprep.subr.bf16.mxu1 %v1432_v58 }
  0x42   :  { %1332 = vmatpush3.bf16.msra.mxu0 %v1433_v59 }
  0x43   :  { %1360 = vmatpush3.bf16.msra.mxu1 %v1434_v60  ;;  %1333 = vmatprep.subr.bf16.mxu0 %v1436_v63 }
  0x44   :  { %1361 = vmatprep.subr.bf16.mxu1 %v1437_v1 }
  0x46   :  { %1334 = vmatpush3.bf16.msra.mxu0 %v1439_v2 }
  0x47   :  { %1362 = vmatpush3.bf16.msra.mxu1 %v1440_v3  ;;  %1335 = vmatprep.subr.bf16.mxu0 %v1443_v7 }
  0x48   :  { %1363 = vmatprep.subr.bf16.mxu1 %v1444_v8 }
  0x4a   :  { %1336 = vmatpush3.bf16.msra.mxu0 %v1445_v9 }
  0x4b   :  { %1364 = vmatpush3.bf16.msra.mxu1 %v1446_v10  ;;  %1337 = vmatprep.subr.bf16.mxu0 %v1447_v11 }
  0x4c   :  { %1365 = vmatprep.subr.bf16.mxu1 %v1448_v12 }
  0x4e   :  { %1338 = vmatpush3.bf16.msra.mxu0 %v1449_v13 }
  0x4f   :  { %1366 = vmatpush3.bf16.msra.mxu1 %v1450_v14 }
  0x51   :  { %781 = vmatmul.mubr.bf16.vlgmr.msra.gmra.mrb[8].mxu0 %v1186_v18 }
  0x52   :  { %829 = vmatmul.mubr.bf16.vlgmr.msra.gmra.mrb[8].mxu1 %v1188_v23  ;;  %788 = vmatprep.mubr.bf16.mxu0 %v1195_v25 }
  0x53   :  { %836 = vmatprep.mubr.bf16.mxu1 %v1197_v26 }
  0x59   :  { %789 = vmatmul.mubr.bf16.gmra.mrb[12].mxu0 %v1194_v30 }
  0x5a   :  { %837 = vmatmul.mubr.bf16.gmra.mrb[12].mxu1 %v1196_v31 }
  0xab   :  { %v41_v32 = vpop.permute.xlu0 %40 }
  0xac   :  { %54 = vst.msk [vmem:[#allocation2] sm:$0xff] %vm53_vm0, %v41_v32  ;;  %v51_v33 = vpop.permute.xlu1 %50 }
  0xad   :  { %56 = vst.msk [vmem:[#allocation2 + $0x10] sm:$0xff] %vm53_vm0, %v51_v33 }
  0xaf   :  { %v46_v34 = vpop.permute.xlu0 %45 }
  0xb0   :  { %55 = vst.msk [vmem:[#allocation2 + $0x8] sm:$0xff] %vm53_vm0, %v46_v34 }
  0xb3   :  { %v57_v8 = vld [vmem:[#allocation2] sm:$0xff] }
  0xb4   :  { %v59_v27 = vld [vmem:[#allocation2 + $0x10] sm:$0xff] }
  0xb7   :  { %v58_v12 = vld [vmem:[#allocation2 + $0x8] sm:$0xff] }
 0x104   :  { %v1283_v35 = vpop.f32.mrb[0].mxu0 }
 0x105   :  { %v1311_v36 = vpop.f32.mrb[0].mxu1  ;;  %v1284_v37 = vpop.f32.mrb[1].mxu0 }
 0x106   :  { %v1285_v38 = vadd.f32 %v1284_v37, %v1283_v35  ;;  %v1312_v39 = vpop.f32.mrb[1].mxu1  ;;  %v1286_v40 = vpop.f32.mrb[2].mxu0 }
 0x107   :  { %v1313_v41 = vadd.f32 %v1312_v39, %v1311_v36  ;;  %v1314_v42 = vpop.f32.mrb[2].mxu1  ;;  %v1287_v43 = vpop.f32.mrb[3].mxu0 }
 0x108   :  { %v1288_v44 = vadd.f32 %v1287_v43, %v1286_v40  ;;  %v1315_v45 = vpop.f32.mrb[3].mxu1 }
 0x109   :  { %v735_v46 = vadd.f32 %v1313_v41, %v1285_v38  ;;  %v1316_v47 = vadd.f32 %v1315_v45, %v1314_v42 }
 0x10b   :  { %v738_v48 = vadd.f32 %v1316_v47, %v1288_v44 }
 0x10c   :  { %v1289_v49 = vpop.f32.mrb[4].mxu0 }
 0x10d   :  { %v1290_v50 = vpop.f32.mrb[5].mxu0  ;;  %v1317_v54 = vpop.f32.mrb[4].mxu1 }
 0x10e   :  { %v1291_v51 = vadd.f32 %v1290_v50, %v1289_v49  ;;  %v1292_v52 = vpop.f32.mrb[6].mxu0  ;;  %v1318_v55 = vpop.f32.mrb[5].mxu1 }
 0x10f   :  { %v1293_v53 = vpop.f32.mrb[7].mxu0  ;;  %v1319_v56 = vadd.f32 %v1318_v55, %v1317_v54  ;;  %v1320_v57 = vpop.f32.mrb[6].mxu1 }
 0x110   :  { %v1321_v58 = vpop.f32.mrb[7].mxu1 }
 0x111   :  { %v743_v59 = vadd.f32 %v1319_v56, %v1291_v51 }
 0x124   :  { %v1339_v60 = vpop.f32.mrb[8].mxu0 }
 0x125   :  { %v1367_v61 = vpop.f32.mrb[8].mxu1  ;;  %v1340_v62 = vpop.f32.mrb[9].mxu0 }
 0x126   :  { %v1341_v63 = vadd.f32 %v1340_v62, %v1339_v60  ;;  %v1368_v0 = vpop.f32.mrb[9].mxu1  ;;  %v1342_v1 = vpop.f32.mrb[10].mxu0 }
 0x127   :  { %v1369_v2 = vadd.f32 %v1368_v0, %v1367_v61  ;;  %v1370_v3 = vpop.f32.mrb[10].mxu1  ;;  %v1343_v4 = vpop.f32.mrb[11].mxu0 }
 0x128   :  { %v783_v5 = vadd.f32 %v1341_v63, %v735_v46  ;;  %v1344_v6 = vadd.f32 %v1343_v4, %v1342_v1  ;;  %v1371_v7 = vpop.f32.mrb[11].mxu1 }
 0x129   :  { %v1372_v9 = vadd.f32 %v1371_v7, %v1370_v3 }
 0x12a   :  { %v831_v10 = vadd.f32 %v1369_v2, %v783_v5  ;;  %v786_v11 = vadd.f32 %v1344_v6, %v738_v48 }
 0x12c   :  { %v844_v13 = vadd.f32 %v831_v10, %v57_v8  ;;  %v834_v14 = vadd.f32 %v1372_v9, %v786_v11  ;;  %v1345_v15 = vpop.f32.mrb[12].mxu0 }
 0x12d   :  { %v1373_v16 = vpop.f32.mrb[12].mxu1  ;;  %v1346_v17 = vpop.f32.mrb[13].mxu0 }
 0x12e   :  { %848 = vst.msk [vmem:[#allocation2] sm:$0xff] %vm53_vm0, %v844_v13  ;;  %v845_v18 = vadd.f32 %v834_v14, %v58_v12  ;;  %v1347_v19 = vadd.f32 %v1346_v17, %v1345_v15  ;;  %v1374_v20 = vpop.f32.mrb[13].mxu1  ;;  %v1348_v21 = vpop.f32.mrb[14].mxu0 }
 0x12f   :  { %v1375_v22 = vadd.f32 %v1374_v20, %v1373_v16  ;;  %v1376_v23 = vpop.f32.mrb[14].mxu1  ;;  %v1349_v24 = vpop.f32.mrb[15].mxu0 }
 0x130   :  { %849 = vst.msk [vmem:[#allocation2 + $0x8] sm:$0xff] %vm53_vm0, %v845_v18  ;;  %v791_v25 = vadd.f32 %v1347_v19, %v743_v59  ;;  %v1377_v26 = vpop.f32.mrb[15].mxu1 }
 0x132   :  { %v839_v28 = vadd.f32 %v1375_v22, %v791_v25 }
 0x134   :  { %v846_v29 = vadd.f32 %v839_v28, %v59_v27 }
 0x135   :  { %v854_v30 = vld [vmem:[#allocation2] sm:$0xff] }
 0x136   :  { %v857_v31 = vsel %vm53_vm0, %v854_v30, -inf  ;;  %850 = vst.msk [vmem:[#allocation2 + $0x10] sm:$0xff] %vm53_vm0, %v846_v29 }
 0x137   :  { %v858_v32 = vrot.slane %v857_v31, 4  ;;  %v855_v33 = vld [vmem:[#allocation2 + $0x8] sm:$0xff] }
 0x138   :  { %v899_v34 = vsel %vm53_vm0, %v855_v33, -inf }
 0x139   :  { %v859_v35 = vmax.f32 %v857_v31, %v858_v32  ;;  %v900_v36 = vrot.slane %v899_v34, 4 }
 0x13b   :  { %v860_v37 = vrot.slane %v859_v35, 2  ;;  %v901_v38 = vmax.f32 %v899_v34, %v900_v36 }
 0x13d   :  { %v861_v39 = vmax.f32 %v859_v35, %v860_v37  ;;  %v902_v40 = vrot.slane %v901_v38, 2  ;;  %v856_v41 = vld [vmem:[#allocation2 + $0x10] sm:$0xff] }
 0x13e   :  { %v941_v42 = vsel %vm53_vm0, %v856_v41, -inf }
 0x13f   :  { %v862_v43 = vrot.slane %v861_v39, 1  ;;  %v903_v44 = vmax.f32 %v901_v38, %v902_v40  ;;  %v942_v45 = vrot.slane %v941_v42, 4 }
 0x141   :  { %v863_v46 = vmax.f32 %v861_v39, %v862_v43  ;;  %v904_v47 = vrot.slane %v903_v44, 1  ;;  %v943_v48 = vmax.f32 %v941_v42, %v942_v45 }
 0x143   :  { %v1793_v49 = vsub.f32 %v854_v30, %v863_v46  ;;  %v905_v50 = vmax.f32 %v903_v44, %v904_v47  ;;  %v944_v51 = vrot.slane %v943_v48, 2 }
 0x145   :  { %v865_v52 = vmul.f32 1.442695, %v1793_v49  ;;  %v1796_v53 = vsub.f32 %v855_v33, %v905_v50  ;;  %v945_v54 = vmax.f32 %v943_v48, %v944_v51 }
 0x147   :  { %1455 = vpow2.f32 %v865_v52  ;;  %v907_v55 = vmul.f32 1.442695, %v1796_v53  ;;  %v946_v56 = vrot.slane %v945_v54, 1 }
 0x149   :  { %1457 = vpow2.f32 %v907_v55  ;;  %v947_v57 = vmax.f32 %v945_v54, %v946_v56 }
 0x14b   :  { %v1799_v58 = vsub.f32 %v856_v41, %v947_v57 }
 0x14d   :  { %v949_v59 = vmul.f32 1.442695, %v1799_v58 }
 0x14f   :  { %1459 = vpow2.f32 %v949_v59 }
 0x151   :  { %v1456_v60 = vpop.eup %1455 }
 0x152   :  { %v867_v61 = vsel %vm53_vm0, %v1456_v60, 0.0  ;;  %v876_v62 = vmul.f32 %v1456_v60, %v1456_v60 }
 0x153   :  { %v1458_v63 = vpop.eup %1457  ;;  %v868_v0 = vrot.slane %v867_v61, 4 }
 0x154   :  { %v877_v1 = vmul.f32 %v876_v62, %v876_v62  ;;  %v909_v2 = vsel %vm53_vm0, %v1458_v63, 0.0  ;;  %v918_v3 = vmul.f32 %v1458_v63, %v1458_v63 }
 0x155   :  { %v869_v4 = vadd.f32 %v868_v0, %v867_v61  ;;  %v910_v5 = vrot.slane %v909_v2, 4 }
 0x156   :  { %v878_v6 = vmul.f32 %v1456_v60, %v877_v1  ;;  %v919_v9 = vmul.f32 %v918_v3, %v918_v3 }
 0x157   :  { %v870_v7 = vrot.slane %v869_v4, 2  ;;  %v911_v8 = vadd.f32 %v910_v5, %v909_v2 }
 0x158   :  { %v879_v10 = vsel %vm53_vm0, %v878_v6, 0.0  ;;  %v920_v19 = vmul.f32 %v1458_v63, %v919_v9 }
 0x159   :  { %v1460_v11 = vpop.eup %1459  ;;  %v871_v12 = vadd.f32 %v870_v7, %v869_v4  ;;  %v880_v13 = vrot.slane %v879_v10, 4  ;;  %v912_v14 = vrot.slane %v911_v8, 2 }
 0x15a   :  { %v951_v15 = vsel %vm53_vm0, %v1460_v11, 0.0  ;;  %v960_v16 = vmul.f32 %v1460_v11, %v1460_v11  ;;  %v921_v28 = vsel %vm53_vm0, %v920_v19, 0.0 }
 0x15b   :  { %v872_v17 = vrot.slane %v871_v12, 1  ;;  %v913_v18 = vadd.f32 %v912_v14, %v911_v8  ;;  %v881_v20 = vadd.f32 %v880_v13, %v879_v10  ;;  %v952_v21 = vrot.slane %v951_v15, 4 }
 0x15c   :  { %v961_v22 = vmul.f32 %v960_v16, %v960_v16  ;;  %v922_v32 = vrot.slane %v921_v28, 4 }
 0x15d   :  { %v873_v23 = vadd.f32 %v872_v17, %v871_v12  ;;  %v914_v24 = vrot.slane %v913_v18, 1  ;;  %v953_v25 = vadd.f32 %v952_v21, %v951_v15  ;;  %v882_v29 = vrot.slane %v881_v20, 2 }
 0x15e   :  { %v962_v26 = vmul.f32 %v1460_v11, %v961_v22  ;;  %v923_v37 = vadd.f32 %v922_v32, %v921_v28 }
 0x15f   :  { %1461 = vrcp.f32 %v873_v23  ;;  %v915_v27 = vadd.f32 %v914_v24, %v913_v18  ;;  %v954_v30 = vrot.slane %v953_v25, 2  ;;  %v883_v34 = vadd.f32 %v882_v29, %v881_v20 }
 0x160   :  { %v963_v31 = vsel %vm53_vm0, %v962_v26, 0.0  ;;  %v924_v43 = vrot.slane %v923_v37, 2 }
 0x161   :  { %1463 = vrcp.f32 %v915_v27  ;;  %v955_v33 = vadd.f32 %v954_v30, %v953_v25  ;;  %v964_v36 = vrot.slane %v963_v31, 4  ;;  %v884_v39 = vrot.slane %v883_v34, 1 }
 0x162   :  { %v925_v51 = vadd.f32 %v924_v43, %v923_v37 }
 0x163   :  { %v956_v35 = vrot.slane %v955_v33, 1  ;;  %v965_v40 = vadd.f32 %v964_v36, %v963_v31  ;;  %v885_v45 = vadd.f32 %v884_v39, %v883_v34 }
 0x164   :  { %v926_v61 = vrot.slane %v925_v51, 1 }
 0x165   :  { %v957_v38 = vadd.f32 %v956_v35, %v955_v33  ;;  %v966_v48 = vrot.slane %v965_v40, 2 }
 0x166   :  { %v927_v6 = vadd.f32 %v926_v61, %v925_v51 }
 0x167   :  { %1465 = vrcp.f32 %v957_v38  ;;  %v967_v56 = vadd.f32 %v966_v48, %v965_v40 }
 0x168   :  { %1467 = vlog2.f32 %v873_v23 }
 0x169   :  { %v1462_v41 = vpop.eup %1461  ;;  %1469 = vlog2.f32 %v915_v27  ;;  %v968_v1 = vrot.slane %v967_v56, 1 }
 0x16a   :  { %v1808_v42 = vmul.f32 %v1462_v41, %v1456_v60  ;;  %1471 = vrcp.f32 %v885_v45 }
 0x16b   :  { %v1464_v44 = vpop.eup %1463  ;;  %1473 = vlog2.f32 %v957_v38  ;;  %v969_v13 = vadd.f32 %v968_v1, %v967_v56 }
 0x16c   :  { %v890_v46 = vmul.f32 %v1808_v42, %v1793_v49  ;;  %v1812_v47 = vmul.f32 %v1464_v44, %v1458_v63  ;;  %1475 = vrcp.f32 %v927_v6 }
 0x16d   :  { %1477 = vrcp.f32 %v969_v13 }
 0x16e   :  { %v891_v50 = vsel %vm53_vm0, %v890_v46, 0.0  ;;  %v932_v52 = vmul.f32 %v1812_v47, %v1796_v53  ;;  %v983_v63 = vadd.f32 %v1812_v47, %v1808_v42 }
 0x16f   :  { %v892_v54 = vrot.slane %v891_v50, 4 }
 0x170   :  { %v933_v55 = vsel %vm53_vm0, %v932_v52, 0.0 }
 0x171   :  { %v893_v57 = vadd.f32 %v892_v54, %v891_v50  ;;  %v934_v59 = vrot.slane %v933_v55, 4  ;;  %v1466_v60 = vpop.eup %1465 }
 0x172   :  { %v1820_v0 = vmul.f32 %v1466_v60, %v1460_v11  ;;  %v1468_v2 = vpop.eup %1467 }
 0x173   :  { %v894_v49 = vrot.slane %v893_v57, 2  ;;  %v935_v62 = vadd.f32 %v934_v59, %v933_v55  ;;  %v1470_v12 = vpop.eup %1469  ;;  %v889_v14 = vmul.f32 0.6931472, %v1468_v2 }
 0x174   :  { %v974_v4 = vmul.f32 %v1820_v0, %v1799_v58  ;;  %v984_v5 = vadd.f32 %v983_v63, %v1820_v0  ;;  %v1827_v18 = vpop.eup %1471  ;;  %v931_v21 = vmul.f32 0.6931472, %v1470_v12 }
 0x175   :  { %v895_v53 = vadd.f32 %v894_v49, %v893_v57  ;;  %v936_v3 = vrot.slane %v935_v62, 2  ;;  %v990_v26 = vmul.f32 %v1827_v18, %v1827_v18  ;;  %v1474_v29 = vpop.eup %1473 }
 0x176   :  { %v975_v9 = vsel %vm53_vm0, %v974_v4, 0.0  ;;  %v985_v10 = vmul.f32 0.33333334, %v984_v5  ;;  %v973_v46 = vmul.f32 0.6931472, %v1474_v29  ;;  %v1836_v59 = vpop.eup %1475 }
 0x177   :  { %v896_v7 = vrot.slane %v895_v53, 1  ;;  %v937_v8 = vadd.f32 %v936_v3, %v935_v62  ;;  %v976_v11 = vrot.slane %v975_v9, 4 }
 0x178   :  { %v992_v17 = vsub.f32 %v1808_v42, %v985_v10  ;;  %v1045_v19 = vsub.f32 %v1812_v47, %v985_v10  ;;  %v1098_v37 = vsub.f32 %v1820_v0, %v985_v10 }
 0x179   :  { %v897_v15 = vadd.f32 %v896_v7, %v895_v53  ;;  %v938_v16 = vrot.slane %v937_v8, 1  ;;  %v977_v58 = vadd.f32 %v976_v11, %v975_v9  ;;  %v1840_v53 = vpop.eup %1477 }
 0x17a   :  { %v993_v23 = vand.u32 2147483647, %v992_v17  ;;  %v1046_v33 = vand.u32 2147483647, %v1045_v19  ;;  %v1099_v57 = vand.u32 2147483647, %v1098_v37 }
 0x17b   :  { %v898_v20 = vsub.f32 %v889_v14, %v897_v15  ;;  %v939_v22 = vadd.f32 %v938_v16, %v937_v8  ;;  %v978_v24 = vrot.slane %v977_v58, 2  ;;  %v991_v14 = vmul.f32 %v990_v26, %v990_v26 }
 0x17c   :  { %v994_v28 = vsel %vm53_vm0, %v993_v23, 0.0  ;;  %v1005_v32 = vsel %vm53_vm0, %v993_v23, -inf  ;;  %v1047_v52 = vsel %vm53_vm0, %v1046_v33, 0.0  ;;  %v1058_v5 = vsel %vm53_vm0, %v1046_v33, -inf }
 0x17d   :  { %v986_v25 = vmul.f32 0.48089835, %v898_v20  ;;  %v940_v27 = vsub.f32 %v931_v21, %v939_v22  ;;  %v979_v30 = vadd.f32 %v978_v24, %v977_v58  ;;  %v995_v31 = vrot.slane %v994_v28, 4 }
 0x17e   :  { %v1014_v38 = vsub.f32 0.0, %v898_v20  ;;  %v1006_v41 = vrot.slane %v1005_v32, 4  ;;  %v1048_v2 = vrot.slane %v1047_v52, 4  ;;  %v1059_v9 = vrot.slane %v1058_v5, 4 }
 0x17f   :  { %v987_v34 = vmul.f32 -2.0, %v986_v25  ;;  %v1262_v35 = vadd.f32 -0.5, %v986_v25  ;;  %v1039_v36 = vmul.f32 0.48089835, %v940_v27  ;;  %v980_v39 = vrot.slane %v979_v30, 1 }
 0x180   :  { %v996_v40 = vadd.f32 %v995_v31, %v994_v28  ;;  %v1007_v56 = vmax.f32 %v1005_v32, %v1006_v41  ;;  %v1015_v60 = vmul.f32 1.442695, %v1014_v38  ;;  %v1067_v63 = vsub.f32 0.0, %v940_v27 }
 0x181   :  { %v988_v43 = vmul.f32 1.442695, %v987_v34  ;;  %v1028_v44 = vmax.f32 %v1262_v35, 0.0  ;;  %v1040_v45 = vmul.f32 -2.0, %v1039_v36  ;;  %v1263_v48 = vadd.f32 -0.5, %v1039_v36 }
 0x182   :  { %v981_v50 = vadd.f32 %v980_v39, %v979_v30  ;;  %v997_v51 = vrot.slane %v996_v40, 2  ;;  %v1008_v1 = vrot.slane %v1007_v56, 2  ;;  %v1049_v8 = vadd.f32 %v1048_v2, %v1047_v52 }
 0x183   :  { %v1029_v54 = vsub.f32 0.0, %v1028_v44  ;;  %v1041_v55 = vmul.f32 1.442695, %v1040_v45  ;;  %v1081_v61 = vmax.f32 %v1263_v48, 0.0  ;;  %1479 = vpow2.f32 %v988_v43 }
 0x184   :  { %v1838_v49 = vsub.f32 %v973_v46, %v981_v50  ;;  %v998_v62 = vadd.f32 %v997_v51, %v996_v40  ;;  %v1009_v12 = vmax.f32 %v1007_v56, %v1008_v1  ;;  %v1100_v11 = vsel %vm53_vm0, %v1099_v57, 0.0 }
 0x185   :  { %v1082_v3 = vsub.f32 0.0, %v1081_v61  ;;  %v1030_v7 = vmul.f32 0.5, %v1029_v54  ;;  %1481 = vpow2.f32 %v1041_v55  ;;  %v1050_v16 = vrot.slane %v1049_v8, 2 }
 0x186   :  { %v999_v4 = vrot.slane %v998_v62, 1  ;;  %v1092_v6 = vmul.f32 0.48089835, %v1838_v49  ;;  %v1060_v17 = vmax.f32 %v1058_v5, %v1059_v9  ;;  %v1068_v58 = vmul.f32 1.442695, %v1067_v63 }
 0x187   :  { %v1083_v15 = vmul.f32 0.5, %v1082_v3  ;;  %v1101_v21 = vrot.slane %v1100_v11, 4  ;;  %1483 = vpow2.f32 %v1015_v60  ;;  %v1043_v22 = vmul.f32 %v1836_v59, %v1836_v59 }
 0x188   :  { %v1000_v10 = vadd.f32 %v999_v4, %v998_v62  ;;  %v1093_v13 = vmul.f32 -2.0, %v1092_v6  ;;  %v1051_v23 = vadd.f32 %v1050_v16, %v1049_v8  ;;  %v1061_v24 = vrot.slane %v1060_v17, 2 }
 0x189   :  { %v1031_v25 = vmul.f32 1.442695, %v1030_v7  ;;  %v1010_v28 = vrot.slane %v1009_v12, 1  ;;  %v1102_v29 = vadd.f32 %v1101_v21, %v1100_v11  ;;  %v1084_v30 = vmul.f32 1.442695, %v1083_v15 }
 0x18a   :  { %v1001_v19 = vmul.f32 0.125, %v1000_v10  ;;  %v1094_v20 = vmul.f32 1.442695, %v1093_v13  ;;  %v1052_v31 = vrot.slane %v1051_v23, 1  ;;  %v1062_v26 = vmax.f32 %v1060_v17, %v1061_v24 }
 0x18b   :  { %v1103_v32 = vrot.slane %v1102_v29, 2  ;;  %v1111_v37 = vsel %vm53_vm0, %v1099_v57, -inf  ;;  %v1019_v38 = vmul.f32 0.4, %v991_v14  ;;  %v1044_v41 = vmul.f32 %v1043_v22, %v1043_v22 }
 0x18c   :  { %v1002_v27 = vsub.f32 1.0, %v1001_v19  ;;  %1485 = vpow2.f32 %v1094_v20  ;;  %v1053_v35 = vadd.f32 %v1052_v31, %v1051_v23  ;;  %v1063_v36 = vrot.slane %v1062_v26, 1 }
 0x18d   :  { %1487 = vpow2.f32 %v1068_v58  ;;  %v1480_v33 = vpop.eup %1479  ;;  %v1104_v39 = vadd.f32 %v1103_v32, %v1102_v29  ;;  %v1011_v43 = vmax.f32 %v1009_v12, %v1010_v28  ;;  %v1112_v50 = vrot.slane %v1111_v37, 4 }
 0x18e   :  { %v1003_v34 = vmul.f32 %v1002_v27, %v1002_v27  ;;  %1489 = vpow2.f32 %v1031_v25  ;;  %v1054_v44 = vmul.f32 0.125, %v1053_v35  ;;  %v1018_v45 = vmul.f32 0.15, %v1480_v33 }
 0x18f   :  { %v1482_v40 = vpop.eup %1481  ;;  %1491 = vpow2.f32 %v1084_v30  ;;  %v1064_v46 = vmax.f32 %v1062_v26, %v1063_v36  ;;  %v1105_v48 = vrot.slane %v1104_v39, 1  ;;  %v1120_v54 = vsub.f32 0.0, %v1838_v49 }
 0x190   :  { %v1004_v51 = vmul.f32 %v1003_v34, %v1002_v27  ;;  %v1055_v52 = vsub.f32 1.0, %v1054_v44  ;;  %v1265_v55 = vadd.f32 -0.5, %v1092_v6  ;;  %v1071_v56 = vmul.f32 0.15, %v1482_v40 }
 0x191   :  { %v1096_v57 = vmul.f32 %v1840_v53, %v1840_v53  ;;  %v1106_v60 = vadd.f32 %v1105_v48, %v1104_v39  ;;  %v1113_v61 = vmax.f32 %v1111_v37, %v1112_v50  ;;  %v1484_v62 = vpop.eup %1483  ;;  %v1012_v63 = vmul.f32 %v1827_v18, %v1011_v43 }
 0x192   :  { %v1056_v1 = vmul.f32 %v1055_v52, %v1055_v52  ;;  %v1121_v2 = vmul.f32 1.442695, %v1120_v54  ;;  %v1134_v3 = vmax.f32 %v1265_v55, 0.0  ;;  %v1072_v4 = vmul.f32 0.4, %v1044_v41 }
 0x193   :  { %v1065_v5 = vmul.f32 %v1836_v59, %v1064_v46  ;;  %v1107_v7 = vmul.f32 0.125, %v1106_v60  ;;  %v1114_v8 = vrot.slane %v1113_v61, 2  ;;  %v1020_v49 = vadd.f32 %v1019_v38, %v1018_v45 }
 0x194   :  { %v1021_v6 = vmul.f32 0.25, %v1004_v51  ;;  %v1057_v10 = vmul.f32 %v1056_v1, %v1055_v52  ;;  %1493 = vpow2.f32 %v1121_v2  ;;  %v1073_v13 = vadd.f32 %v1072_v4, %v1071_v56 }
 0x195   :  { %v1097_v11 = vmul.f32 %v1096_v57, %v1096_v57  ;;  %v1108_v14 = vsub.f32 1.0, %v1107_v7  ;;  %v1115_v15 = vmax.f32 %v1113_v61, %v1114_v8  ;;  %v1013_v16 = vmul.f32 %v1012_v63, %v1012_v63 }
 0x196   :  { %v1486_v9 = vpop.eup %1485  ;;  %v1074_v17 = vmul.f32 0.25, %v1057_v10  ;;  %v1135_v58 = vsub.f32 0.0, %v1134_v3  ;;  %v1066_v20 = vmul.f32 %v1065_v5, %v1065_v5  ;;  %v1022_v25 = vadd.f32 %v1021_v6, %v1020_v49 }
 0x197   :  { %v1488_v12 = vpop.eup %1487  ;;  %v1109_v21 = vmul.f32 %v1108_v14, %v1108_v14  ;;  %v1116_v22 = vrot.slane %v1115_v15, 1  ;;  %v1124_v23 = vmul.f32 0.15, %v1486_v9  ;;  %v1125_v31 = vmul.f32 0.4, %v1097_v11 }
 0x198   :  { %v1490_v19 = vpop.eup %1489  ;;  %v1136_v27 = vmul.f32 0.5, %v1135_v58  ;;  %v1075_v28 = vadd.f32 %v1074_v17, %v1073_v13  ;;  %v1017_v26 = vmul.f32 %v1484_v62, %v1827_v18  ;;  %v1023_v32 = vmul.f32 0.1, %v1013_v16 }
 0x199   :  { %v1492_v24 = vpop.eup %1491  ;;  %v1110_v29 = vmul.f32 %v1109_v21, %v1108_v14  ;;  %v1117_v30 = vmax.f32 %v1115_v15, %v1116_v22  ;;  %v1070_v34 = vmul.f32 %v1488_v12, %v1836_v59  ;;  %v1076_v35 = vmul.f32 0.1, %v1066_v20 }
 0x19a   :  { %v1137_v33 = vmul.f32 1.442695, %v1136_v27  ;;  %v1126_v37 = vadd.f32 %v1125_v31, %v1124_v23  ;;  %v1033_v38 = vmul.f32 0.1, %v1490_v19  ;;  %v1024_v39 = vadd.f32 %v1023_v32, %v1022_v25 }
 0x19b   :  { %v1118_v36 = vmul.f32 %v1840_v53, %v1117_v30  ;;  %v1086_v40 = vmul.f32 0.1, %v1492_v24  ;;  %v1077_v41 = vadd.f32 %v1076_v35, %v1075_v28  ;;  %v1127_v44 = vmul.f32 0.25, %v1110_v29 }
 0x19c   :  { %1495 = vpow2.f32 %v1137_v33  ;;  %v1025_v46 = vmul.f32 0.1, %v1017_v26  ;;  %v1078_v18 = vmul.f32 0.1, %v1070_v34  ;;  %v1034_v50 = vadd.f32 0.9, %v1033_v38 }
 0x19d   :  { %v1119_v43 = vmul.f32 %v1118_v36, %v1118_v36  ;;  %v1128_v48 = vadd.f32 %v1127_v44, %v1126_v37  ;;  %v1087_v59 = vadd.f32 0.9, %v1086_v40  ;;  %v1037_v63 = vstv %s1036_s1 }
 0x19e   :  { %v1494_v45 = vpop.eup %1493  ;;  %v1026_v51 = vadd.f32 %v1025_v46, %v1024_v39  ;;  %v1079_v52 = vadd.f32 %v1078_v18, %v1077_v41  ;;  %v1090_v1 = vstv %s1264_s2  ;;  %v1143_v8 = vstv %s1266_s15 }
 0x19f   :  { %v1123_v54 = vmul.f32 %v1494_v45, %v1840_v53  ;;  %v1129_v55 = vmul.f32 0.1, %v1119_v43 }
 0x1a0   :  { %v1035_v57 = vmul.f32 %v1034_v50, %v1026_v51  ;;  %v1088_v60 = vmul.f32 %v1087_v59, %v1079_v52 }
 0x1a1   :  { %v1130_v56 = vadd.f32 %v1129_v55, %v1128_v48  ;;  %v1131_v61 = vmul.f32 0.1, %v1123_v54 }
 0x1a2   :  { %v1038_v4 = vmul.f32 %v1037_v63, %v1035_v57  ;;  %v1091_v5 = vmul.f32 %v1090_v1, %v1088_v60 }
 0x1a3   :  { %v1132_v2 = vadd.f32 %v1131_v61, %v1130_v56 }
 0x1a4   :  { %v1145_v6 = vadd.f32 %v1091_v5, %v1038_v4  ;;  %v1150_v12 = vmul.f32 %v1038_v4, %v1808_v42  ;;  %v1151_v13 = vmul.f32 %v1091_v5, %v1812_v47 }
 0x1a6   :  { %v1496_v62 = vpop.eup %1495  ;;  %v1152_v14 = vadd.f32 %v1151_v13, %v1150_v12 }
 0x1a7   :  { %v1139_v3 = vmul.f32 0.1, %v1496_v62 }
 0x1a9   :  { %v1140_v7 = vadd.f32 0.9, %v1139_v3 }
 0x1ab   :  { %v1141_v9 = vmul.f32 %v1140_v7, %v1132_v2 }
 0x1ad   :  { %v1144_v49 = vmul.f32 %v1143_v8, %v1141_v9 }
 0x1af   :  { %v1146_v10 = vadd.f32 %v1145_v6, %v1144_v49  ;;  %v1153_v11 = vmul.f32 %v1144_v49, %v1820_v0 }
 0x1b1   :  { %v1147_v53 = vadd.f32 1e-10, %v1146_v10  ;;  %v1154_v15 = vadd.f32 %v1153_v11, %v1152_v14 }
 0x1b3   :  { %1497 = vrcp.f32 %v1147_v53 }
 0x1bd   :  { %v1498_v16 = vpop.eup %1497 }
 0x1be   :  { %v1155_v17 = vmul.f32 %v1498_v16, %v1154_v15 }
 0x1c0   :  { %v1156_v58 = vmul.f32 1.0526316, %v1155_v17 }
 0x1c2   :  { %v1157_v19 = vsel %vm53_vm0, %v1156_v58, -inf }
 0x1c3   :  { %v1158_v20 = vrot.slane %v1157_v19, 4 }
 0x1c5   :  { %v1159_v21 = vmax.f32 %v1157_v19, %v1158_v20 }
 0x1c7   :  { %v1160_v22 = vrot.slane %v1159_v21, 2 }
 0x1c9   :  { %v1161_v23 = vmax.f32 %v1159_v21, %v1160_v22 }
 0x1cb   :  { %v1162_v24 = vrot.slane %v1161_v23, 1 }
 0x1cd   :  { %v1163_v25 = vmax.f32 %v1161_v23, %v1162_v24 }
 0x1cf   :  { %v1164_v27 = vsub.f32 %v1156_v58, %v1163_v25 }
 0x1d1   :  { %v1165_v28 = vmul.f32 1.442695, %v1164_v27 }
 0x1d3   :  { %1499 = vpow2.f32 %v1165_v28 }
 0x1dd   :  { %v1500_v42 = vpop.eup %1499 }
 0x1de   :  { %v1167_v47 = vsel %vm53_vm0, %v1500_v42, 0.0 }
 0x1df   :  { %v1168_v0 = vrot.slane %v1167_v47, 4 }
 0x1e1   :  { %v1169_v29 = vadd.f32 %v1168_v0, %v1167_v47 }
 0x1e3   :  { %v1170_v30 = vrot.slane %v1169_v29, 2 }
 0x1e5   :  { %v1171_v31 = vadd.f32 %v1170_v30, %v1169_v29 }
 0x1e7   :  { %v1172_v26 = vrot.slane %v1171_v31, 1 }
 0x1e9   :  { %v1173_v32 = vadd.f32 %v1172_v26, %v1171_v31 }
 0x1eb   :  { %1501 = vrcp.f32 %v1173_v32 }
 0x1f5   :  { %v1502_v33 = vpop.eup %1501 }
 0x1f6   :  { %v1175_v34 = vmul.f32 %v1502_v33, %v1500_v42 }
 0x1f8   :  { %1176 = vst.msk [vmem:[%s1870_s4] sm:$0xff] %vm53_vm0, %v1175_v34 }
 0x1f9   :  { %1181 = vsyncpa [#allocation4], 1 }

</bundles_post_ra>
